<compile_context>
chip_gen: v7x
topology: tpu7x:2x2x1
jax: 0.10.0
libtpu: 0.0.40
codegen_flags: <defaults>
</compile_context>

<pallas_src>
import jax
import jax.numpy as jnp
from jax.experimental import pallas as pl
from jax.experimental.pallas import tpu as pltpu

_LANE = 128
_TARGET_BYTES = 2 << 20  # ~2 MiB per tile (per array); 2 arrays x 2 buffers ~= 8 MiB VMEM


def _least_square_kernel(x_ref, o_ref):
    x = x_ref[...]
    t = jnp.clip(x, -1.0, 1.0)                      # weakly-typed consts: stays in x's dtype
    y = t * (t + 2.0) + 4.0 * jnp.maximum(x - 1.0, 0.0)
    o_ref[...] = y.astype(o_ref.dtype)


def _sublane(itemsize):
    # sublane packing: 8 for 4-byte, 16 for 2-byte, 32 for 1-byte dtypes
    return max(8, 32 // itemsize)


def _round_down(v, m):
    return max(m, (v // m) * m)


def _round_up(v, m):
    return -(-v // m) * m


def _cost(n_elems, itemsize):
    return pl.CostEstimate(
        flops=6 * n_elems,
        transcendentals=0,
        bytes_accessed=2 * n_elems * itemsize,
    )


def _run_2d(x2):
    """x2: 2-D array laid out natively (no relayout was needed to get here)."""
    M, C = x2.shape
    itemsize = jnp.dtype(x2.dtype).itemsize
    sub = _sublane(itemsize)
    target_elems = max(1, _TARGET_BYTES // itemsize)

    # Lane-dim block: full C, or a 128-aligned tile of it when C is aligned & big.
    if C % _LANE == 0:
        bc = min(C, _round_down(max(target_elems // sub, _LANE), _LANE))
    else:
        bc = C

    # Sublane-dim block: sized by bytes, rounded to the sublane pack, and capped
    # at ~ceil(M/4) so mid-size inputs still get >= ~4 pipelined grid steps.
    row_budget = max(sub, _round_down(target_elems // bc, sub))
    quarter = max(sub, _round_up(_round_up(M, 4) // 4, sub))
    br = min(row_budget, quarter)
    if br >= M:
        br = M

    grid = (pl.cdiv(M, br), pl.cdiv(C, bc))
    return pl.pallas_call(
        _least_square_kernel,
        out_shape=jax.ShapeDtypeStruct((M, C), x2.dtype),
        grid=grid,
        in_specs=[pl.BlockSpec((br, bc), lambda i, j: (i, j))],
        out_specs=pl.BlockSpec((br, bc), lambda i, j: (i, j)),
        compiler_params=pltpu.CompilerParams(
            dimension_semantics=("parallel", "parallel")),
        cost_estimate=_cost(M * C, itemsize),
    )(x2)


def _run_3d(x3):
    """x3: (L, R, C) with the native trailing (R, C) layout kept intact."""
    L, R, C = x3.shape
    itemsize = jnp.dtype(x3.dtype).itemsize
    sub = _sublane(itemsize)
    target_elems = max(1, _TARGET_BYTES // itemsize)

    bc = C  # trailing dim not 128-aligned on this path -> block must span it fully
    row_budget = max(sub, _round_down(max(target_elems // bc, sub), sub))
    if row_budget >= R:
        br = R
        slab_elems = R * C
        bl_budget = max(1, target_elems // slab_elems)
        bl = min(L, bl_budget, max(1, _round_up(L, 4) // 4))
    else:
        br = row_budget  # sublane-aligned tile of R; partial last block is masked
        bl = 1

    grid = (pl.cdiv(L, bl), pl.cdiv(R, br))
    return pl.pallas_call(
        _least_square_kernel,
        out_shape=jax.ShapeDtypeStruct((L, R, C), x3.dtype),
        grid=grid,
        in_specs=[pl.BlockSpec((bl, br, bc), lambda i, j: (i, j, 0))],
        out_specs=pl.BlockSpec((bl, br, bc), lambda i, j: (i, j, 0)),
        compiler_params=pltpu.CompilerParams(
            dimension_semantics=("parallel", "parallel")),
        cost_estimate=_cost(L * R * C, itemsize),
    )(x3)


def least_square(x):
    """Elementwise LeastSquare forward for any float shape/dtype."""
    orig_shape = x.shape
    if x.ndim == 0:
        return _run_2d(x.reshape(1, 1)).reshape(orig_shape)
    if x.ndim == 1:
        return _run_2d(x.reshape(1, -1)).reshape(orig_shape)
    if x.ndim == 2:
        return _run_2d(x)

    R, C = orig_shape[-2], orig_shape[-1]
    sub = _sublane(jnp.dtype(x.dtype).itemsize)
    if C % _LANE == 0 and R % sub == 0:
        # Collapsing everything above the lane dim is a layout-preserving
        # (bitcast) reshape when the trailing two dims are tile-aligned.
        M = 1
        for d in orig_shape[:-1]:
            M *= d
        return _run_2d(x.reshape(M, C)).reshape(orig_shape)

    # Unaligned trailing dims: keep the native (R, C) trailing layout and only
    # collapse the leading dims (always layout-preserving) -> no relayout copy.
    L = 1
    for d in orig_shape[:-2]:
        L *= d
    return _run_3d(x.reshape(L, R, C)).reshape(orig_shape)


def least_square_ref(x):
    # Pure-JAX reference matching the PyTorch autograd Function's forward.
    mask_le_mone = (x <= -1.0).astype(x.dtype)
    mask_ge_one = (x >= 1.0).astype(x.dtype)
    mask_mone_one = ((x > -1.0) & (x < 1.0)).astype(x.dtype)
    return (
        (-1.0) * mask_le_mone
        + ((1.0 + x) ** 2 - 1.0) * mask_mone_one
        + (x * 4.0 - 1.0) * mask_ge_one
    )


if __name__ == "__main__":
    key = jax.random.PRNGKey(0)

    # NCHW input (unaligned trailing dims -> native-layout 3-D path),
    # values spanning all three branches of the piecewise function.
    x = jax.random.normal(key, (2, 4, 16, 16), dtype=jnp.float32) * 2.0
    out = jax.block_until_ready(least_square(x))
    ref = least_square_ref(x)
    assert out.shape == x.shape and out.dtype == x.dtype
    assert jnp.allclose(out, ref, atol=1e-5, rtol=1e-5), "mismatch vs reference (NCHW path)"

    # Lane-aligned 2-D input (collapse/2-D path), non-multiple-of-8 rows to
    # exercise a partial last block.
    x2 = jax.random.normal(jax.random.PRNGKey(1), (20, 256), dtype=jnp.float32) * 2.0
    out2 = jax.block_until_ready(least_square(x2))
    assert jnp.allclose(out2, least_square_ref(x2), atol=1e-5, rtol=1e-5), \
        "mismatch vs reference (2D aligned path)"

    print("KERNEL_OK")
</pallas_src>

<mosaic_0001>
module attributes {stable_mosaic.version = 11 : i64} {
  func.func @_least_square_kernel(%arg0: i32, %arg1: i32, %arg2: memref<2x16x16xf32, #tpu.memory_space<vmem>>, %arg3: memref<2x16x16xf32, #tpu.memory_space<vmem>>) attributes {dimension_semantics = [#tpu.dimension_semantics<parallel>, #tpu.dimension_semantics<parallel>], iteration_bounds = array<i64: 4, 1>, scalar_prefetch = 0 : i64, scratch_operands = 0 : i64, tpu.core_type = #tpu.core_type<tc>, window_params = [{transform_indices = @transform_0, window_bounds = array<i64: 2, 16, 16>}, {transform_indices = @transform_1, window_bounds = array<i64: 2, 16, 16>}]} {
    %c0 = arith.constant 0 : index
    %c0_0 = arith.constant 0 : index
    %c0_1 = arith.constant 0 : index
    %0 = vector.load %arg2[%c0, %c0_0, %c0_1] : memref<2x16x16xf32, #tpu.memory_space<vmem>>, vector<2x16x16xf32>
    %cst = arith.constant -1.000000e+00 : f32
    %cst_2 = arith.constant 1.000000e+00 : f32
    %1 = vector.broadcast %cst : f32 to vector<2x16x16xf32>
    %2 = arith.maximumf %1, %0 : vector<2x16x16xf32>
    %3 = vector.broadcast %cst_2 : f32 to vector<2x16x16xf32>
    %4 = arith.minimumf %3, %2 : vector<2x16x16xf32>
    %cst_3 = arith.constant 2.000000e+00 : f32
    %5 = vector.broadcast %cst_3 : f32 to vector<2x16x16xf32>
    %6 = arith.addf %4, %5 : vector<2x16x16xf32>
    %7 = arith.mulf %4, %6 : vector<2x16x16xf32>
    %cst_4 = arith.constant 1.000000e+00 : f32
    %8 = vector.broadcast %cst_4 : f32 to vector<2x16x16xf32>
    %9 = arith.subf %0, %8 : vector<2x16x16xf32>
    %cst_5 = arith.constant 0.000000e+00 : f32
    %10 = vector.broadcast %cst_5 : f32 to vector<2x16x16xf32>
    %11 = arith.maximumf %9, %10 : vector<2x16x16xf32>
    %cst_6 = arith.constant 4.000000e+00 : f32
    %12 = vector.broadcast %cst_6 : f32 to vector<2x16x16xf32>
    %13 = arith.mulf %12, %11 : vector<2x16x16xf32>
    %14 = arith.addf %7, %13 : vector<2x16x16xf32>
    %c0_7 = arith.constant 0 : index
    %c0_8 = arith.constant 0 : index
    %c0_9 = arith.constant 0 : index
    %15 = vector.load %arg3[%c0_7, %c0_8, %c0_9] : memref<2x16x16xf32, #tpu.memory_space<vmem>>, vector<2x16x16xf32>
    tpu.vector_store %arg3[%c0_7, %c0_8, %c0_9], %14 {strides = array<i32>} : memref<2x16x16xf32, #tpu.memory_space<vmem>>, vector<2x16x16xf32>,
    return
  }
  func.func @transform_0(%arg0: i32, %arg1: i32) -> (i32, i32, i32) {
    %c0_i32 = arith.constant 0 : i32
    %c0_i32_0 = arith.constant 0 : i32
    return %arg0, %arg1, %c0_i32 : i32, i32, i32
  }
  func.func @transform_1(%arg0: i32, %arg1: i32) -> (i32, i32, i32) {
    %c0_i32 = arith.constant 0 : i32
    %c0_i32_0 = arith.constant 0 : i32
    return %arg0, %arg1, %c0_i32 : i32, i32, i32
  }
}

</mosaic_0001>

<bundles_post_ra>
// kernel: tpu_custom_call.1
= control target key start
LH: loop header
LB: loop body
LE: loop exit
PB: predicated region body
PF: predicated region fallthrough
CT: control target
= control target key end

     0   :  { %6 = vsyncpa [#allocation3], 0  ;;  %s705_s0 = inlined_call_operand.hbm [shape: f32[8,16,16], index: 0, kind: input, shape index: {}]   ;;  %s706_s1 = inlined_call_operand.hbm [shape: f32[8,16,16], index: 1, kind: output, shape index: {}]  }
   0x1   :  { %8 = vsyncpa [#allocation3 + $0x1], 0 }
   0x2   :  { %9 = vsyncpa [#allocation4], 0 }
   0x3   :  { %11 = vsyncpa [#allocation4 + $0x1], 0  ;;  %s528_s6 = smov 0   ;;  %s530_s7 = smov 0  }
   0x4   :  { %s532_s8 = smov 0   ;;  %s534_s9 = smov 0  }
   0x5   :  { %s536_s10 = smov 0   ;;  %s538_s11 = smov 0  }
   0x6 LB: > { %s303_s12 = sadd.s32 4294967295, %s510_s11   ;;  %s304_s13 = sadd.s32 4294967294, %s510_s11   ;;  %s510_s11 = sphi %s538_s11, %s17_s11   ;;  %s506_s10 = sphi %s536_s10, %s720_s10   ;;  %s502_s9 = sphi %s534_s9, %s719_s9   ;;  %s498_s8 = sphi %s532_s8, %s718_s8   ;;  %s494_s7 = sphi %s530_s7, %s717_s7   ;;  %s490_s6 = sphi %s528_s6, %s716_s6  }
   0x7   : > { %s29_s14 = sadd.s32 1, %s506_s10  ;;  %s38_s15 = sadd.s32 1, %s498_s8 }
   0x8   : > { %p31_p0 = scmp.ge.s32.totalorder %s29_s14, 4  ;;  %p45_p1 = scmp.ne.s32.totalorder %s498_s8, %s494_s7 }
   0x9   : > { %p46_p2 = scmp.eq.s32.totalorder %s510_s11, 0  ;;  %p51_p3 = scmp.ne.s32.totalorder %s494_s7, %s490_s6 }
   0xa   : > { %s722_s14 = smov (%p31_p0, %s29_s14), 0  ;;  %p52_p5 = scmp.eq.s32.totalorder %s303_s12, 0 }
   0xb   : > { %p569_p4 = por %p46_p2, %p45_p1  ;;  %s33_s17 = ssub.s32 %s506_s10, %s722_s14 }
   0xc   : > { %p77_p6 = scmp.eq.s32.totalorder %s303_s12, 3  ;;  %p36_p7 = scmp.eq.s32.totalorder %s33_s17, 0 }
   0xd   : > { %p575_p8 = por %p52_p5, %p51_p3  ;;  %p83_p10 = scmp.eq.s32.totalorder %s304_s13, 3 }
   0xe   : > { %p579_p9 = por %p77_p6, %p45_p1  ;;  %p344_p12 = scmp.lt.s32.totalorder %s510_s11, 4 }
   0xf   : > { %s584_s20 = scalar_select %p36_p7, %s498_s8, %s38_s15  }
  0x10   : > { %s710_s19 = scalar_select %p579_p9, 1, 0 }
  0x11   : > { %p586_p11 = por %p83_p10, %p51_p3  ;;  %s103_s22 = sand.u32 1, %s498_s8  }
  0x12   : > { %s307_s23 = sshll.u32 %s103_s22, 5  ;;  %s329_s24 = sshll.u32 %s506_s10, 9 }
  0x13   : > { %s711_s21 = scalar_select %p586_p11, 1, 0 }
  0x14   : > { %s596_s27 = scalar_lea.hbm %s705_s0, %s329_s24  ;;  %s107_s28 = scalar_lea.vmem [#allocation2], %s307_s23 }
  0x15   : > { %s117_s29 = sshll.u32 %s107_s28, 4  ;;  %p602_p13 = pnand %p344_p12, %p569_p4  ;;  %s598_s29 = int_to_ptr.vmem [resolvable:$true] %s117_s29 }
  0x16   : > { %s607_s2 = scalar_lea.sflag [#allocation3], %s103_s22  ;;  %s398_s3 = scalar_lea.hbm %s596_s27, 512 }
  0x17   : > { %p399_p1 = scmp.ne.s32.totalorder %s596_s27, %s398_s3  ;;  %p400_p2 = pneg %p602_p13 }
  0x18   : > { %s403_s12 = scalar_lea.hbm %s705_s0, 2048  ;;  %p404_p4 = scmp.lt.u32.totalorder %s596_s27, %s705_s0 }
  0x19   : > { %p401_p3 = pnand %p400_p2, %p399_p1  ;;  %p405_p6 = scmp.lt.u32.totalorder %s403_s12, %s398_s3 }
  0x1a   : > { %p407_p10 = scmp.lt.u32.totalorder %s398_s3, %s596_s27 }
  0x1b   : > { %p402_p5 = pneg %p401_p3  ;;  %p406_p7 = por %p405_p6, %p404_p4 }
  0x1d   : > { %p408_p12 = por %p407_p10, %p406_p7 }
  0x1f   : > { %p409_p0 = pnand %p408_p12, %p402_p5 }
  0x21   : > { %412 = shalt.err (!%p409_p0)
}
  0x22   : > { %s413_s16 = scalar_lea.vmem %s598_s29, 512  ;;  %s512_s17 = smov [#allocation2]  }
  0x23   : > { %p414_p1 = scmp.ne.s32.totalorder %s598_s29, %s413_s16  ;;  %s418_s22 = sshll.u32 %s512_s17, 4  ;;  %s419_s22 = int_to_ptr.vmem [resolvable:$false] %s418_s22 }
  0x24   : > { %s420_s23 = scalar_lea.vmem %s419_s22, 1024  ;;  %p421_p9 = scmp.lt.s32.totalorder %s598_s29, %s419_s22 }
  0x25   : > { %p416_p3 = pnand %p414_p1, %p400_p2  ;;  %p422_p4 = scmp.lt.s32.totalorder %s420_s23, %s413_s16 }
  0x27   : > { %p417_p11 = pneg %p416_p3  ;;  %p423_p6 = por %p422_p4, %p421_p9 }
  0x29   : > { %p424_p7 = pnand %p423_p6, %p417_p11 }
  0x2b   : > { %427 = shalt.err (!%p424_p7)
}
  0x2c   : > { %s513_s24 = smov 128   ;;  %s514_s25 = smov 8  }
  0x2d   : > { %339 = dma.hbm_to_vmem [thread:$0]  (!%p602_p13), %s596_s27, 512, %s598_s29, %s607_s2, %s513_s24, %s513_s24, %s514_s25  }
  0x2e   : > { %p125_p0 = scmp.lt.s32.totalorder %s510_s11, 5  ;;  %p713_p2 = scmp.ge.s32.totalorder %s510_s11, 1 }
  0x30   : > { %p126_p5 = pnand %p713_p2, %p125_p0 }
  0x31   : > { %s639_s26 = sand.u32 (!%p126_p5), 1, %s494_s7  }
  0x32   : > { %129 = sbr.rel (%p126_p5) target bundleno = 85 (0x55), region = 24  ;;  %s312_s28 = sshll.u32 (!%p126_p5), %s639_s26, 5 }
  0x33   : > { %s132_s3 = scalar_lea.sflag (!%p126_p5), [#allocation3], %s639_s26  ;;  %s135_s4 = scalar_lea.vmem (!%p126_p5), [#allocation2], %s312_s28 }
  0x39   : > { %481 = dma.done.wait (%p575_p8), %s132_s3, 512  }
  0x3a   : > { %483 = vsyncadd (%p575_p8), %s132_s3, 4294966784  ;;  %v158_v0 = vld [vmem:[%s135_s4] sm:$0xff]  ;;  %vm194_vm0 = vcmask 130048   ;;  %v159_v1 = vld [vmem:[%s135_s4 + $0x8] sm:$0xff]  ;;  %s153_s18 = scalar_lea.vmem [#allocation5], %s312_s28  ;;  %s331_s29 = sshll.u32 %s502_s9, 9 }
  0x3b   : > { %v160_v2 = vld [vmem:[%s135_s4 + $0x10] sm:$0xff]  ;;  %v314_v3 = vclamps-f32 %v158_v0, 1.0  ;;  %v318_v4 = vadd.f32 -1.0, %v158_v0  ;;  %v315_v5 = vclamps-f32 %v159_v1, 1.0  ;;  %v319_v6 = vadd.f32 -1.0, %v159_v1  ;;  %v161_v7 = vld [vmem:[%s135_s4 + $0x18] sm:$0xff]  ;;  %s653_s9 = scalar_lea.hbm %s706_s1, %s331_s29 }
  0x3c   : > { %v316_v8 = vclamps-f32 %v160_v2, 1.0  ;;  %v320_v9 = vadd.f32 -1.0, %v160_v2  ;;  %v317_v10 = vclamps-f32 %v161_v7, 1.0  ;;  %v321_v11 = vadd.f32 -1.0, %v161_v7  ;;  %s216_s27 = sshll.u32 %s153_s18, 4  ;;  %s200_s5 = scalar_lea.sflag [#allocation4], %s639_s26  ;;  %s648_s27 = int_to_ptr.vmem [resolvable:$true] %s216_s27 }
  0x3d   : > { %v170_v12 = vadd.f32 2.0, %v314_v3  ;;  %v182_v13 = vmax.f32 %v318_v4, 0.0  ;;  %v171_v14 = vadd.f32 2.0, %v315_v5  ;;  %v183_v15 = vmax.f32 %v319_v6, 0.0  ;;  %s428_s12 = scalar_lea.vmem %s648_s27, 512  ;;  %p714_p9 = scmp.ne.s32.totalorder %s710_s19, 0 }
  0x3e   : > { %v172_v16 = vadd.f32 2.0, %v316_v8  ;;  %v184_v17 = vmax.f32 %v320_v9, 0.0  ;;  %v173_v18 = vadd.f32 2.0, %v317_v10  ;;  %v185_v19 = vmax.f32 %v321_v11, 0.0  ;;  %p429_p8 = scmp.ne.s32.totalorder %s648_s27, %s428_s12  ;;  %s515_s13 = smov [#allocation5]  }
  0x3f   : > { %v174_v20 = vmul.f32 %v314_v3, %v170_v12  ;;  %v186_v21 = vmul.f32 4.0, %v182_v13  ;;  %v175_v22 = vmul.f32 %v315_v5, %v171_v14  ;;  %v187_v23 = vmul.f32 4.0, %v183_v15  ;;  %s432_s15 = sshll.u32 %s515_s13, 4  ;;  %s433_s15 = int_to_ptr.vmem [resolvable:$false] %s432_s15 }
  0x40   : > { %v176_v24 = vmul.f32 %v316_v8, %v172_v16  ;;  %v188_v25 = vmul.f32 4.0, %v184_v17  ;;  %v177_v26 = vmul.f32 %v317_v10, %v173_v18  ;;  %v189_v27 = vmul.f32 4.0, %v185_v19  ;;  %p430_p11 = pnand %p429_p8, %p714_p9  ;;  %s434_s16 = scalar_lea.vmem %s433_s15, 1024 }
  0x41   : > { %v190_v28 = vadd.f32 %v186_v21, %v174_v20  ;;  %v191_v29 = vadd.f32 %v187_v23, %v175_v22  ;;  %p435_p10 = scmp.lt.s32.totalorder %s648_s27, %s433_s15  ;;  %p436_p12 = scmp.lt.s32.totalorder %s434_s16, %s428_s12 }
  0x42   : > { %v192_v30 = vadd.f32 %v188_v25, %v176_v24  ;;  %v193_v31 = vadd.f32 %v189_v27, %v177_v26  ;;  %p431_p13 = pneg %p430_p11 }
  0x43   : > { %195 = vst.msk [vmem:[%s153_s18] sm:$0xff] %vm194_vm0, %v190_v28  ;;  %196 = vst.msk [vmem:[%s153_s18 + $0x8] sm:$0xff] %vm194_vm0, %v191_v29  ;;  %p437_p1 = por %p436_p12, %p435_p10 }
  0x44   : > { %197 = vst.msk [vmem:[%s153_s18 + $0x10] sm:$0xff] %vm194_vm0, %v192_v30  ;;  %198 = vst.msk [vmem:[%s153_s18 + $0x18] sm:$0xff] %vm194_vm0, %v193_v31 }
  0x45   : > { %p438_p3 = pnand %p437_p1, %p431_p13 }
  0x47   : > { %441 = shalt.err (!%p438_p3)
}
  0x48   : > { %s442_s17 = scalar_lea.hbm %s653_s9, 512  ;;  %s446_s24 = scalar_lea.hbm %s706_s1, 2048 }
  0x49   : > { %p443_p4 = scmp.ne.s32.totalorder %s653_s9, %s442_s17  ;;  %p447_p0 = scmp.lt.u32.totalorder %s653_s9, %s706_s1 }
  0x4a   : > { %p448_p2 = scmp.lt.u32.totalorder %s446_s24, %s442_s17  ;;  %p450_p8 = scmp.lt.u32.totalorder %s442_s17, %s653_s9 }
  0x4b   : > { %p444_p6 = pnand %p443_p4, %p714_p9 }
  0x4c   : > { %p449_p5 = por %p448_p2, %p447_p0 }
  0x4d   : > { %p445_p7 = pneg %p444_p6 }
  0x4e   : > { %p451_p11 = por %p450_p8, %p449_p5 }
  0x50   : > { %p452_p13 = pnand %p451_p11, %p445_p7 }
  0x52   : > { %455 = shalt.err (!%p452_p13)
}
  0x53   : > { %s516_s3 = smov 128   ;;  %s517_s4 = smov 8  }
  0x54   : > { %334 = dma.vmem_to_hbm [thread:$0]  (%p714_p9), %s648_s27, 512, %s653_s9, %s200_s5, %s516_s3, %s516_s3, %s517_s4  }
  0x55 PF: > { %p345_p10 = scmp.ge.s32.totalorder %s510_s11, 2  ;;  %s231_s18 = sand.u32 1, %s490_s6  }
  0x56   : > { %p715_p12 = scmp.ne.s32.totalorder %s711_s21, 0  ;;  %s232_s29 = scalar_lea.sflag [#allocation4], %s231_s18 }
  0x58   : > { %p341_p1 = pnand %p345_p10, %p715_p12 }
  0x5a   : > { %485 = dma.done.wait (!%p341_p1), %s232_s29, 512  }
  0x5b   : > { %487 = vsyncadd (!%p341_p1), %s232_s29, 4294966784  ;;  %s17_s11 = sadd.s32 1, %s510_s11   ;;  %s716_s6 = smov %s494_s7 }
  0x5c   : > { %p14_p3 = scmp.ge.s32.totalorder %s17_s11, 6   ;;  %s717_s7 = smov %s498_s8 }
  0x5d   : > { %s718_s8 = smov %s584_s20  ;;  %s719_s9 = smov %s506_s10 }
  0x5e   : > { %s720_s10 = smov %s722_s14  ;;  %16 = sbr.rel (!%p14_p3) target bundleno = 6 (0x6), region = 69 }
  0x65   :  { %237 = vsyncpa [#allocation3], 1 }
  0x66   :  { %239 = vsyncpa [#allocation3 + $0x1], 1 }
  0x67   :  { %240 = vsyncpa [#allocation4], 1 }
  0x68   :  { %242 = vsyncpa [#allocation4 + $0x1], 1 }

</bundles_post_ra>
